<compile_context>
chip_gen: v6e
topology: v6e:2x2x1
jax: 0.10.0
libtpu: 0.0.40
codegen_flags: <defaults>
</compile_context>

<pallas_src>
from functools import partial

import jax
import jax.numpy as jnp
from jax.experimental import pallas as pl
from jax.experimental.pallas import tpu as pltpu


def _round_up(x, m):
    return ((x + m - 1) // m) * m


def _vmem_capacity_bytes():
    """Physical VMEM per TensorCore; falls back to the smallest gen (v7x, 64 MiB)."""
    try:
        cap = getattr(pltpu.get_tpu_info(), "vmem_capacity_bytes", None)
        if cap:
            return int(cap)
    except Exception:
        pass
    return 64 * 1024 * 1024


# ---------------------------------------------------------------------------
# Kernels
# ---------------------------------------------------------------------------
def ps_kernel_3d(fused_ref, h_ref, w_ref, b_ref, out_ref, proj_ref, *,
                 hidden_dim, padded_dim):
    """FiLM over a (TB, TS, H) hidden tile.

    fused_ref : (TB, D)       fused user/item features (same block for all s)
    h_ref     : (TB, TS, H)   hidden-states tile
    w_ref     : (D, 2*Hp)     [w_scale | w_bias], lane-padded halves (resident)
    b_ref     : (1, 2*Hp)     [b_scale + 1 | b_bias]
    out_ref   : (TB, TS, H)
    proj_ref  : (TB, 2*Hp)    f32 VMEM scratch holding the projection for batch tile i
    """
    s = pl.program_id(1)

    # The projection depends only on the batch tile: compute once per i (at s == 0)
    # and reuse it from VMEM scratch across all sequence tiles.
    @pl.when(s == 0)
    def _():
        proj_ref[...] = (
            jnp.dot(fused_ref[...], w_ref[...], preferred_element_type=jnp.float32)
            + b_ref[...])

    proj = proj_ref[...]                                              # (TB, 2*Hp)
    scale = proj[:, :hidden_dim][:, None, :]                          # (TB, 1, H)
    bias = proj[:, padded_dim:padded_dim + hidden_dim][:, None, :]    # (TB, 1, H)
    out_ref[...] = (h_ref[...].astype(jnp.float32) * scale + bias).astype(out_ref.dtype)


def ps_kernel_2d(fused_ref, h_ref, w_ref, b_ref, out_ref, *, hidden_dim, padded_dim):
    """FiLM over a (TB, H) hidden tile (torch 2-D branch): batch maps to sublanes."""
    proj = (jnp.dot(fused_ref[...], w_ref[...], preferred_element_type=jnp.float32)
            + b_ref[...])                                             # (TB, 2*Hp)
    scale = proj[:, :hidden_dim]
    bias = proj[:, padded_dim:padded_dim + hidden_dim]
    out_ref[...] = (h_ref[...].astype(jnp.float32) * scale + bias).astype(out_ref.dtype)


# ---------------------------------------------------------------------------
# Wrapper
# ---------------------------------------------------------------------------
def ps_module_forward(hidden_states, user_hidden_states, item_hidden_states,
                      w_scale, b_scale, w_bias, b_bias, *,
                      block_b=None, block_s=None):
    """PSModule forward.

    hidden_states : (B, S, H) or (B, H)
    user/item     : (B, 1, Du) / (B, 1, Dp)  (or already 2-D (B, Du)/(B, Dp))
    w_scale/w_bias: (Du+Dp, H)   -- transposed from the torch nn.Linear layout
    b_scale/b_bias: (H,)
    """
    assert hidden_states.ndim in (2, 3), "wrong hidden_state dim"
    is_2d = hidden_states.ndim == 2
    if is_2d:
        B, H = hidden_states.shape
        S = 1
    else:
        B, S, H = hidden_states.shape

    # --- wrapper-side glue (tiny, plain JAX) --------------------------------
    fused = jnp.concatenate(
        [user_hidden_states.reshape(B, -1), item_hidden_states.reshape(B, -1)],
        axis=-1)                                                     # (B, D)
    D = fused.shape[-1]

    # Lane-pad each projection half to Hp = round_up(H, 128) so the bias half of
    # the fused (D, 2*Hp) weight starts on a lane boundary (no cross-lane shifts).
    Hp = _round_up(H, 128)
    pad = Hp - H
    w_s, w_b = w_scale, w_bias
    b_s = b_scale.astype(jnp.float32) + 1.0          # fold the FiLM "+1"
    b_b = b_bias.astype(jnp.float32)
    if pad:
        w_s = jnp.pad(w_s, ((0, 0), (0, pad)))
        w_b = jnp.pad(w_b, ((0, 0), (0, pad)))
        b_s = jnp.pad(b_s, (0, pad))
        b_b = jnp.pad(b_b, (0, pad))
    w = jnp.concatenate([w_s, w_b], axis=-1)          # (D, 2*Hp)
    b = jnp.concatenate([b_s, b_b]).reshape(1, 2 * Hp).astype(jnp.float32)
    fused = fused.astype(w.dtype)
    # TODO(synk): for bf16 models, pre-cast hidden/fused/w to bf16 at the caller to
    # halve HBM traffic (kernel keeps the FiLM math in f32 and casts on store).

    # --- generation-aware tile sizing (kernel is HBM-bound on `hidden`) ------
    itemsize = jnp.dtype(hidden_states.dtype).itemsize
    vmem_cap = _vmem_capacity_bytes()
    # ~30% of VMEM for the double-buffered hidden in+out streams:
    #   4 * block_b * block_s * H * itemsize  <=  stream_budget
    stream_budget = int(0.30 * vmem_cap)
    max_rows = max(1, stream_budget // (4 * H * itemsize))   # block_b * block_s rows

    if is_2d:
        bs = 1
    elif block_s is not None:
        bs = min(block_s, S)
    elif S <= max_rows:
        bs = S
    else:
        bs = min(S, max(8, (max_rows // 8) * 8))      # sublane-aligned S tile

    if block_b is None:
        bb = max(1, max_rows // max(1, bs))
    else:
        bb = block_b
    bb = min(bb, B)
    if bb < B:
        # fused (bb, D): sublane dim must be a multiple of 8 (or the full B).
        bb = (bb // 8) * 8
        bb = B if bb < 8 else bb
    if bb == B and B >= 16:
        # Keep >= 2 grid steps on the parallel batch axis so both TensorCores
        # get work on v7x (harmless on single-TC generations).
        half = _round_up(_round_up(B, 2) // 2, 8)
        if half < B:
            bb = half

    grid_b = pl.cdiv(B, bb)

    # Explicit VMEM limit: resident weights/bias/scratch + double-buffered streams,
    # with slack, capped at 90% of this generation's physical VMEM.
    resident = (w.size * jnp.dtype(w.dtype).itemsize + b.size * 4 + bb * 2 * Hp * 4)
    streams = (2 * bb * D * jnp.dtype(fused.dtype).itemsize
               + 4 * bb * bs * H * itemsize)
    vmem_limit = int(min(max(int(1.5 * (resident + streams)), 16 * 1024 * 1024),
                         int(0.9 * vmem_cap)))

    if is_2d:
        kernel = partial(ps_kernel_2d, hidden_dim=H, padded_dim=Hp)
        return pl.pallas_call(
            kernel,
            out_shape=jax.ShapeDtypeStruct((B, H), hidden_states.dtype),
            grid_spec=pltpu.PrefetchScalarGridSpec(
                num_scalar_prefetch=0,
                grid=(grid_b,),
                in_specs=[
                    pl.BlockSpec((bb, D), lambda i: (i, 0)),        # fused
                    pl.BlockSpec((bb, H), lambda i: (i, 0)),        # hidden (B, H)
                    pl.BlockSpec((D, 2 * Hp), lambda i: (0, 0)),    # fused weights
                    pl.BlockSpec((1, 2 * Hp), lambda i: (0, 0)),    # fused biases
                ],
                out_specs=pl.BlockSpec((bb, H), lambda i: (i, 0)),
            ),
            compiler_params=pltpu.CompilerParams(
                dimension_semantics=("parallel",),
                vmem_limit_bytes=vmem_limit,
            ),
        )(fused, hidden_states, w, b)

    grid_s = pl.cdiv(S, bs)
    kernel = partial(ps_kernel_3d, hidden_dim=H, padded_dim=Hp)
    return pl.pallas_call(
        kernel,
        out_shape=jax.ShapeDtypeStruct((B, S, H), hidden_states.dtype),
        grid_spec=pltpu.PrefetchScalarGridSpec(
            num_scalar_prefetch=0,
            grid=(grid_b, grid_s),
            in_specs=[
                pl.BlockSpec((bb, D), lambda i, s: (i, 0)),          # fused
                pl.BlockSpec((bb, bs, H), lambda i, s: (i, s, 0)),   # hidden
                pl.BlockSpec((D, 2 * Hp), lambda i, s: (0, 0)),      # fused weights
                pl.BlockSpec((1, 2 * Hp), lambda i, s: (0, 0)),      # fused biases
            ],
            out_specs=pl.BlockSpec((bb, bs, H), lambda i, s: (i, s, 0)),
            scratch_shapes=[pltpu.VMEM((bb, 2 * Hp), jnp.float32)],
        ),
        compiler_params=pltpu.CompilerParams(
            dimension_semantics=("parallel", "arbitrary"),
            vmem_limit_bytes=vmem_limit,
        ),
    )(fused, hidden_states, w, b)


if __name__ == "__main__":
    # Small config: usr_dim=16, prd_dim=16, hidden_states=128 (lane-dense),
    # batch=16, seq=8.  Exercises both the 3-D and 2-D hidden branches.
    B, S, H = 16, 8, 128
    Du, Dp = 16, 16
    D = Du + Dp

    key = jax.random.PRNGKey(0)
    k1, k2, k3, k4, k5, k6, k7, k8 = jax.random.split(key, 8)

    hidden3 = jax.random.normal(k1, (B, S, H), dtype=jnp.float32)
    hidden2 = jax.random.normal(k8, (B, H), dtype=jnp.float32)
    user_h = jax.random.normal(k2, (B, 1, Du), dtype=jnp.float32)
    item_h = jax.random.normal(k3, (B, 1, Dp), dtype=jnp.float32)

    # Deterministic "nn.Linear"-style init: uniform(-1/sqrt(D), 1/sqrt(D)).
    bound = 1.0 / (D ** 0.5)
    w_scale = jax.random.uniform(k4, (D, H), jnp.float32, -bound, bound)
    b_scale = jax.random.uniform(k5, (H,), jnp.float32, -bound, bound)
    w_bias = jax.random.uniform(k6, (D, H), jnp.float32, -bound, bound)
    b_bias = jax.random.uniform(k7, (H,), jnp.float32, -bound, bound)

    out3 = ps_module_forward(hidden3, user_h, item_h,
                             w_scale, b_scale, w_bias, b_bias)
    out3 = jax.block_until_ready(out3)
    out2 = ps_module_forward(hidden2, user_h, item_h,
                             w_scale, b_scale, w_bias, b_bias)
    out2 = jax.block_until_ready(out2)

    # Pure-JAX reference check.
    fused = jnp.concatenate([user_h, item_h], axis=-1)          # (B, 1, D)
    inj_s = fused @ w_scale + b_scale                           # (B, 1, H)
    inj_b = fused @ w_bias + b_bias                             # (B, 1, H)
    ref3 = hidden3 * (1.0 + inj_s) + inj_b                      # (B, S, H)
    ref2 = hidden2 * (1.0 + inj_s[:, 0, :]) + inj_b[:, 0, :]    # (B, H)

    assert out3.shape == (B, S, H) and out2.shape == (B, H)
    assert jnp.allclose(out3, ref3, atol=1e-5, rtol=1e-5), "3-D mismatch vs reference"
    assert jnp.allclose(out2, ref2, atol=1e-5, rtol=1e-5), "2-D mismatch vs reference"

    print("KERNEL_OK")
</pallas_src>

<mosaic_0001>
module attributes {stable_mosaic.version = 11 : i64} {
  func.func @ps_kernel_3d(%arg0: i32, %arg1: i32, %arg2: memref<8x32xf32, #tpu.memory_space<vmem>>, %arg3: memref<8x8x128xf32, #tpu.memory_space<vmem>>, %arg4: memref<32x256xf32, #tpu.memory_space<vmem>>, %arg5: memref<1x256xf32, #tpu.memory_space<vmem>>, %arg6: memref<8x8x128xf32, #tpu.memory_space<vmem>>, %arg7: memref<8x256xf32, #tpu.memory_space<vmem>>) attributes {dimension_semantics = [#tpu.dimension_semantics<parallel>, #tpu.dimension_semantics<arbitrary>], iteration_bounds = array<i64: 2, 1>, scalar_prefetch = 0 : i64, scratch_operands = 1 : i64, tpu.core_type = #tpu.core_type<tc>, window_params = [{transform_indices = @transform_0, window_bounds = array<i64: 8, 32>}, {transform_indices = @transform_1, window_bounds = array<i64: 8, 8, 128>}, {pipeline_mode = #tpu.pipeline_mode<synchronous>, transform_indices = @transform_2, window_bounds = array<i64: 32, 256>}, {pipeline_mode = #tpu.pipeline_mode<synchronous>, transform_indices = @transform_3, window_bounds = array<i64: 1, 256>}, {transform_indices = @transform_4, window_bounds = array<i64: 8, 8, 128>}]} {
    %c0_i32 = arith.constant 0 : i32
    %0 = arith.cmpi eq, %arg1, %c0_i32 : i32
    %1 = arith.extui %0 : i1 to i32
    %c0_i32_0 = arith.constant 0 : i32
    %2 = arith.cmpi ne, %1, %c0_i32_0 : i32
    scf.if %2 {
      %c0_8 = arith.constant 0 : index
      %c0_9 = arith.constant 0 : index
      %14 = vector.load %arg2[%c0_8, %c0_9] : memref<8x32xf32, #tpu.memory_space<vmem>>, vector<8x32xf32>
      %c0_10 = arith.constant 0 : index
      %c0_11 = arith.constant 0 : index
      %15 = vector.load %arg4[%c0_10, %c0_11] : memref<32x256xf32, #tpu.memory_space<vmem>>, vector<32x256xf32>
      %cst = arith.constant dense<0.000000e+00> : vector<8x256xf32>
      %16 = tpu.matmul %14, %15, %cst {dimension_numbers = #tpu.dot_dimension_numbers<[1], [0], [0], [1], [0, 0, 1, 1], [], []>} : vector<8x32xf32>, vector<32x256xf32>, vector<8x256xf32> -> vector<8x256xf32>
      %c0_12 = arith.constant 0 : index
      %c0_13 = arith.constant 0 : index
      %17 = vector.load %arg5[%c0_12, %c0_13] : memref<1x256xf32, #tpu.memory_space<vmem>>, vector<1x256xf32>
      %18 = vector.broadcast %17 : vector<1x256xf32> to vector<8x256xf32>
      %19 = arith.addf %16, %18 : vector<8x256xf32>
      %c0_14 = arith.constant 0 : index
      %c0_15 = arith.constant 0 : index
      %20 = vector.load %arg7[%c0_14, %c0_15] : memref<8x256xf32, #tpu.memory_space<vmem>>, vector<8x256xf32>
      tpu.vector_store %arg7[%c0_14, %c0_15], %19 {strides = array<i32>} : memref<8x256xf32, #tpu.memory_space<vmem>>, vector<8x256xf32>,
    } else {
    }
    %c0 = arith.constant 0 : index
    %c0_1 = arith.constant 0 : index
    %3 = vector.load %arg7[%c0, %c0_1] : memref<8x256xf32, #tpu.memory_space<vmem>>, vector<8x256xf32>
    %4 = vector.extract_strided_slice %3 {offsets = [0, 0], sizes = [8, 128], strides = [1, 1]} : vector<8x256xf32> to vector<8x128xf32>
    %5 = vector.shape_cast %4 : vector<8x128xf32> to vector<8x1x128xf32>
    %6 = vector.extract_strided_slice %3 {offsets = [0, 128], sizes = [8, 128], strides = [1, 1]} : vector<8x256xf32> to vector<8x128xf32>
    %7 = vector.shape_cast %6 : vector<8x128xf32> to vector<8x1x128xf32>
    %c0_2 = arith.constant 0 : index
    %c0_3 = arith.constant 0 : index
    %c0_4 = arith.constant 0 : index
    %8 = vector.load %arg3[%c0_2, %c0_3, %c0_4] : memref<8x8x128xf32, #tpu.memory_space<vmem>>, vector<8x8x128xf32>
    %9 = vector.broadcast %5 : vector<8x1x128xf32> to vector<8x8x128xf32>
    %10 = arith.mulf %8, %9 : vector<8x8x128xf32>
    %11 = vector.broadcast %7 : vector<8x1x128xf32> to vector<8x8x128xf32>
    %12 = arith.addf %10, %11 : vector<8x8x128xf32>
    %c0_5 = arith.constant 0 : index
    %c0_6 = arith.constant 0 : index
    %c0_7 = arith.constant 0 : index
    %13 = vector.load %arg6[%c0_5, %c0_6, %c0_7] : memref<8x8x128xf32, #tpu.memory_space<vmem>>, vector<8x8x128xf32>
    tpu.vector_store %arg6[%c0_5, %c0_6, %c0_7], %12 {strides = array<i32>} : memref<8x8x128xf32, #tpu.memory_space<vmem>>, vector<8x8x128xf32>,
    return
  }
  func.func @transform_0(%arg0: i32, %arg1: i32) -> (i32, i32) {
    %c0_i32 = arith.constant 0 : i32
    %c0_i32_0 = arith.constant 0 : i32
    return %arg0, %c0_i32 : i32, i32
  }
  func.func @transform_1(%arg0: i32, %arg1: i32) -> (i32, i32, i32) {
    %c0_i32 = arith.constant 0 : i32
    %c0_i32_0 = arith.constant 0 : i32
    return %arg0, %arg1, %c0_i32 : i32, i32, i32
  }
  func.func @transform_2(%arg0: i32, %arg1: i32) -> (i32, i32) {
    %c0_i32 = arith.constant 0 : i32
    %c0_i32_0 = arith.constant 0 : i32
    %c0_i32_1 = arith.constant 0 : i32
    return %c0_i32, %c0_i32_0 : i32, i32
  }
  func.func @transform_3(%arg0: i32, %arg1: i32) -> (i32, i32) {
    %c0_i32 = arith.constant 0 : i32
    %c0_i32_0 = arith.constant 0 : i32
    %c0_i32_1 = arith.constant 0 : i32
    return %c0_i32, %c0_i32_0 : i32, i32
  }
  func.func @transform_4(%arg0: i32, %arg1: i32) -> (i32, i32, i32) {
    %c0_i32 = arith.constant 0 : i32
    %c0_i32_0 = arith.constant 0 : i32
    return %arg0, %arg1, %c0_i32 : i32, i32, i32
  }
}

</mosaic_0001>

<bundles_post_ra>
// kernel: tpu_custom_call.1
= control target key start
LH: loop header
LB: loop body
LE: loop exit
PB: predicated region body
PF: predicated region fallthrough
CT: control target
= control target key end

     0   :  { %s1284_s0 = inlined_call_operand.hbm [shape: f32[16,32], index: 0, kind: input, shape index: {}]   ;;  %s1285_s1 = inlined_call_operand.hbm [shape: f32[16,8,128], index: 1, kind: input, shape index: {}]   ;;  %s1286_s2 = inlined_call_operand.hbm [shape: f32[32,256], index: 2, kind: input, shape index: {}]   ;;  %s1287_s3 = inlined_call_operand.vmem [shape: f32[1,256], index: 3, kind: input, shape index: {}]   ;;  %s1288_s4 = inlined_call_operand.hbm [shape: f32[16,8,128], index: 4, kind: output, shape index: {}]  }
   0x1   :  { %1291 = sst [smem:[#allocation16_spill]] %s1284_s0 }
   0x2   :  { %1292 = sst [smem:[#allocation17_spill]] %s1286_s2 }
   0x3   :  { %9 = vsyncpa [#allocation4], 0 }
   0x4   :  { %11 = vsyncpa [#allocation4 + $0x1], 0 }
   0x5   :  { %12 = vsyncpa [#allocation7], 0 }
   0x6   :  { %14 = vsyncpa [#allocation7 + $0x1], 0 }
   0x7   :  { %15 = vsyncpa [#allocation5], 0 }
   0x8   :  { %17 = vsyncpa [#allocation5 + $0x1], 0  ;;  %s1052_s15 = smov 0   ;;  %s1054_s16 = smov 0  }
   0x9   :  { %s1056_s17 = smov 0   ;;  %s1058_s18 = smov 0  }
   0xa   :  { %s1060_s19 = smov 0   ;;  %s1062_s20 = smov 0  }
   0xb LB: > { %1293 = sst [smem:[#allocation14_spill]] %s1009_s19  ;;  %s1083_s21 = sadd.s32 4294967295, %s1013_s20   ;;  %s1013_s20 = sphi %s1062_s20, %s23_s20   ;;  %s1009_s19 = sphi %s1060_s19, %s1307_s19   ;;  %s1005_s18 = sphi %s1058_s18, %s1306_s18   ;;  %s1001_s17 = sphi %s1056_s17, %s1310_s17   ;;  %s997_s16 = sphi %s1054_s16, %s1309_s16   ;;  %s993_s15 = sphi %s1052_s15, %s1308_s15  }
   0xc   : > { %s735_s22 = sadd.s32 4294967294, %s1013_s20   ;;  %p55_p0 = scmp.ne.s32.totalorder %s997_s16, %s993_s15 }
   0xd   : > { %p56_p1 = scmp.eq.s32.totalorder %s1083_s21, 0  ;;  %p157_p3 = scmp.eq.s32.totalorder %s735_s22, 1 }
   0xe   : > { %p736_p5 = scmp.ge.s32.totalorder %s1013_s20, 1  ;;  %p164_p7 = scmp.lt.s32.totalorder %s1013_s20, 3 }
   0xf   : > { %p1092_p4 = por %p56_p1, %p55_p0  ;;  %p1097_p6 = por %p157_p3, %p55_p0 }
  0x10   : > { %p1102_p8 = pnand %p736_p5, %p164_p7  ;;  %s1015_s26 = smov [#allocation8]  }
  0x11   : > { %s1295_s24 = scalar_select %p1097_p6, 1, 0 }
  0x12   : > { %s176_s27 = sshll.u32 %s1015_s26, 4  ;;  %p767_p9 = pneg %p1102_p8  ;;  %s177_s27 = int_to_ptr.vmem [resolvable:$true] %s176_s27 }
  0x13   : > { %p738_p10 = scmp.ge.s32.totalorder %s1013_s20, 2  ;;  %s35_s29 = sadd.s32 1, %s1009_s19 }
  0x14   : > { %p1111_p11 = pnand %p767_p9, %p56_p1  ;;  %s854_s30 = scalar_lea.vmem %s177_s27, 1024 }
  0x15   : > { %p855_p13 = scmp.ne.s32.totalorder %s177_s27, %s854_s30  ;;  %p862_p5 = scmp.lt.s32.totalorder %s177_s27, %s177_s27 }
  0x16   : > { %p845_p12 = pneg %p1111_p11  ;;  %p863_p7 = scmp.lt.s32.totalorder %s854_s30, %s854_s30 }
  0x18   : > { %p857_p0 = pnand %p855_p13, %p845_p12  ;;  %p864_p2 = por %p863_p7, %p862_p5 }
  0x1a   : > { %p858_p3 = pneg %p857_p0 }
  0x1c   : > { %p865_p6 = pnand %p864_p2, %p858_p3 }
  0x1e   : > { %868 = shalt.err (!%p865_p6)
}
  0x1f   : > { %s1016_s5 = smov 256   ;;  %s1017_s6 = smov 16  }
  0x20   : > { %s1298_s2 = sld [smem:[#allocation17_spill]]  ;;  %p37_p2 = scmp.ge.s32.totalorder %s35_s29, 2 }
  0x21   : > { %s42_s9 = sadd.s32 1, %s1001_s17  ;;  %p49_p6 = scmp.ne.s32.totalorder %s1001_s17, %s997_s16 }
  0x22   : > { %p50_p9 = scmp.eq.s32.totalorder %s1013_s20, 0  ;;  %s1312_s29 = smov (%p37_p2, %s35_s29), 0 }
  0x23   : > { %1299 = sst [smem:[#allocation15_spill]] %s1312_s29  ;;  %p1301_p13 = scmp.eq.s32.totalorder %s1083_s21, 1 }
  0x24   : > { %p1129_p12 = por %p50_p9, %p49_p6  ;;  %s39_s12 = ssub.s32 %s1009_s19, %s1312_s29 }
  0x25   : > { %p1135_p0 = por %p1301_p13, %p49_p6  ;;  %p40_p3 = scmp.eq.s32.totalorder %s39_s12, 0 }
  0x26   : > { %770 = dma.hbm_to_vmem [thread:$0]  (!%p1111_p11), %s1298_s2, 1024, %s177_s27, [#allocation7], %s1016_s5, %s1016_s5, %s1017_s6  }
  0x27   : > { %p783_p11 = scmp.lt.s32.totalorder %s1013_s20, 2  ;;  %s193_s13 = sand.u32 1, %s1001_s17  }
  0x28   : > { %s739_s14 = sshll.u32 %s193_s13, 3  ;;  %s740_s26 = sshll.u32 %s1009_s19, 7 }
  0x29   : > { %s1144_s22 = scalar_select %p40_p3, %s1001_s17, %s42_s9  }
  0x2a   : > { %s1303_s0 = sld [smem:[#allocation16_spill]]  ;;  %s197_s5 = scalar_lea.vmem [#allocation3], %s739_s14 }
  0x2b   : > { %s204_s6 = sshll.u32 %s197_s5, 4  ;;  %p1152_p5 = pnand %p783_p11, %p1129_p12  ;;  %s205_s6 = int_to_ptr.vmem [resolvable:$true] %s204_s6 }
  0x2c   : > { %s741_s8 = sshll.u32 %s193_s13, 6  ;;  %s755_s12 = sshll.u32 %s1009_s19, 10 }
  0x2d   : > { %s194_s2 = scalar_lea.sflag [#allocation4], %s193_s13  ;;  %p871_p7 = pneg %p1152_p5 }
  0x2e   : > { %s882_s9 = scalar_lea.vmem %s205_s6, 128  ;;  %s1018_s14 = smov [#allocation3]  }
  0x2f   : > { %p883_p2 = scmp.ne.s32.totalorder %s205_s6, %s882_s9 }
  0x30   : > { %s202_s30 = scalar_lea.hbm %s1303_s0, %s740_s26  ;;  %s887_s26 = sshll.u32 %s1018_s14, 4  ;;  %s888_s26 = int_to_ptr.vmem [resolvable:$false] %s887_s26 }
  0x31   : > { %p885_p6 = pnand %p883_p2, %p871_p7  ;;  %s889_s10 = scalar_lea.vmem %s888_s26, 256 }
  0x32   : > { %p890_p12 = scmp.lt.s32.totalorder %s205_s6, %s888_s26  ;;  %p891_p13 = scmp.lt.s32.totalorder %s889_s10, %s882_s9 }
  0x33   : > { %p886_p9 = pneg %p885_p6 }
  0x34   : > { %p892_p11 = por %p891_p13, %p890_p12 }
  0x36   : > { %p893_p3 = pnand %p892_p11, %p886_p9 }
  0x38   : > { %896 = shalt.err (!%p893_p3)
}
  0x39   : > { %774 = dma.hbm_to_vmem [thread:$0]  (!%p1152_p5), %s202_s30, 128, %s205_s6, %s194_s2  }
  0x3a   : > { %s215_s13 = scalar_lea.vmem [#allocation6], %s741_s8  ;;  %s211_s28 = sand.u32 1, %s1013_s20  }
  0x3b   : > { %s223_s27 = sshll.u32 %s215_s13, 4  ;;  %s222_s14 = scalar_lea.hbm %s1285_s1, %s755_s12  ;;  %s224_s27 = int_to_ptr.vmem [resolvable:$true] %s223_s27 }
  0x3c   : > { %s212_s29 = scalar_lea.sflag [#allocation7], %s211_s28  ;;  %s910_s19 = scalar_lea.vmem %s224_s27, 1024 }
  0x3d   : > { %p911_p2 = scmp.ne.s32.totalorder %s224_s27, %s910_s19  ;;  %s1019_s9 = smov [#allocation6]  }
  0x3e   : > { %s915_s26 = sshll.u32 %s1019_s9, 4  ;;  %s916_s26 = int_to_ptr.vmem [resolvable:$false] %s915_s26 }
  0x3f   : > { %p913_p6 = pnand %p911_p2, %p871_p7  ;;  %s917_s10 = scalar_lea.vmem %s916_s26, 2048 }
  0x40   : > { %p918_p12 = scmp.lt.s32.totalorder %s224_s27, %s916_s26  ;;  %p919_p13 = scmp.lt.s32.totalorder %s917_s10, %s910_s19 }
  0x41   : > { %p914_p9 = pneg %p913_p6 }
  0x42   : > { %p920_p11 = por %p919_p13, %p918_p12 }
  0x44   : > { %p921_p3 = pnand %p920_p11, %p914_p9 }
  0x46   : > { %924 = shalt.err (!%p921_p3)
}
  0x47   : > { %s1020_s2 = smov 128   ;;  %s1021_s0 = smov 8  }
  0x48   : > { %777 = dma.hbm_to_vmem [thread:$0]  (!%p1152_p5), %s222_s14, 1024, %s224_s27, %s212_s29, %s1020_s2, %s1020_s2, %s1021_s0  }
  0x49   : > { %235 = sbr.rel (%p1102_p8) target bundleno = 321 (0x141), region = 36  ;;  %s1176_s30 = sand.u32 (!%p1102_p8), 1, %s997_s16  }
  0x4a   : > { %s745_s6 = sshll.u32 (!%p1102_p8), %s1176_s30, 3  ;;  %s238_s8 = scalar_lea.sflag (!%p1102_p8), [#allocation4], %s1176_s30 }
  0x4b   : > { %s241_s19 = scalar_lea.vmem (!%p1102_p8), [#allocation3], %s745_s6 }
  0x4e   : > { %976 = dma.done.wait (%p1092_p4), %s238_s8, 128  }
  0x4f   : > { %978 = vsyncadd (%p1092_p4), %s238_s8, 4294967168  ;;  %s246_s25 = sand.u32 1, %s1083_s21   ;;  %s746_s29 = sshll.u32 %s1176_s30, 6 }
  0x50   : > { %s247_s7 = scalar_lea.sflag [#allocation7], %s246_s25  ;;  %s1188_s12 = scalar_lea.vmem [#allocation6], %s746_s29 }
  0x51   : > { %980 = dma.done.wait (%p1092_p4), %s247_s7, 1024  }
  0x52   : > { %982 = vsyncadd (%p1092_p4), %s247_s7, 4294966272 }
  0x53   : > { %984 = dma.done.wait (%p56_p1), [#allocation7], 1024  }
  0x54   : > { %986 = vsyncadd (%p56_p1), [#allocation7], 4294966272  ;;  %v1022_v0 = vmov 0.0   ;;  %v298_v1 = vld [vmem:[#allocation8 + $0x38] sm:$0xff]  ;;  %v297_v2 = vld [vmem:[#allocation8 + $0x30] sm:$0xff]  ;;  %vm311_vm0 = vcmask 261120   ;;  %v301_v10 = vlaneseq }
  0x55   : > { %379 = vmatprep.mubr.f32.mxu0 %v1022_v0  ;;  %v296_v3 = vld [vmem:[#allocation8 + $0x28] sm:$0xff]  ;;  %339 = vmatprep.subr.mxu0 %v298_v1  ;;  %v295_v4 = vld [vmem:[#allocation8 + $0x20] sm:$0xff]  ;;  %v294_v5 = vld [vmem:[#allocation8 + $0x18] sm:$0xff]  ;;  %v1023_v12 = vmov 1966171168   ;;  %s756_s13 = sshll.u32 %s1005_s18, 10 }
  0x56   : > { %340 = vmatpush1.msra.mxu0 %v297_v2  ;;  %v293_v6 = vld [vmem:[#allocation8 + $0x10] sm:$0xff]  ;;  %v292_v7 = vld [vmem:[#allocation8 + $0x8] sm:$0xff]  ;;  %v291_v8 = vld [vmem:[#allocation8] sm:$0xff]  ;;  %v302_v11 = vshrl.u32 %v301_v10, 7  ;;  %v393_v13 = vunpack.c.l.s4 %v1023_v12  ;;  %s283_s27 = scalar_lea.vmem [#allocation9], %s746_s29  ;;  %s1234_s14 = scalar_lea.hbm %s1288_s4, %s756_s13 }
  0x57   : > { %341 = vmatprep.subr.mxu0 %v296_v3  ;;  %v290_v9 = vld [vmem:[%s241_s19] sm:$0xff]  ;;  %v490_v42 = vld [vmem:[%s1188_s12] sm:$0xff]  ;;  %v491_v43 = vld [vmem:[%s1188_s12 + $0x8] sm:$0xff]  ;;  %s617_s28 = sshll.u32 %s283_s27, 4  ;;  %s603_s9 = scalar_lea.sflag [#allocation5], %s1176_s30  ;;  %s1236_s28 = int_to_ptr.vmem [resolvable:$true] %s617_s28 }
  0x58   : > { %342 = vmatpush1.msra.mxu0 %v295_v4  ;;  %v1198_v14 = vsub.s32 0, %v302_v11  ;;  %v299_v15 = vld [vmem:[%s1287_s3] sm:$0x3]  ;;  %v394_v16 = vunpack.c.0.s8 %v393_v13  ;;  %v307_v17 = vsub.s32 1, %v302_v11  ;;  %v493_v46 = vld [vmem:[%s1188_s12 + $0x18] sm:$0xff]  ;;  %v494_v47 = vld [vmem:[%s1188_s12 + $0x20] sm:$0xff] }
  0x59   : > { %343 = vmatprep.subr.mxu0 %v294_v5  ;;  %v492_v44 = vld [vmem:[%s1188_s12 + $0x10] sm:$0xff]  ;;  %v495_v48 = vld [vmem:[%s1188_s12 + $0x28] sm:$0xff]  ;;  %v497_v58 = vld [vmem:[%s1188_s12 + $0x38] sm:$0xff]  ;;  %s925_s26 = scalar_lea.vmem %s1236_s28, 1024  ;;  %s1024_s10 = smov [#allocation9]  }
  0x5a   : > { %344 = vmatpush1.msra.mxu0 %v293_v6  ;;  %v304_v18 = vrot.slane %v299_v15, %v1198_v14  ;;  %v397_v19 = vsub.s32 %v394_v16, %v302_v11  ;;  %v308_v20 = vrot.slane %v299_v15, %v307_v17  ;;  %v496_v57 = vld [vmem:[%s1188_s12 + $0x30] sm:$0xff]  ;;  %p926_p1 = scmp.ne.s32.totalorder %s1236_s28, %s925_s26  ;;  %s929_s2 = sshll.u32 %s1024_s10, 4  ;;  %s930_s2 = int_to_ptr.vmem [resolvable:$false] %s929_s2 }
  0x5b   : > { %345 = vmatprep.subr.mxu0 %v292_v7  ;;  %s931_s0 = scalar_lea.vmem %s930_s2, 2048  ;;  %p932_p5 = scmp.lt.s32.totalorder %s1236_s28, %s930_s2 }
  0x5c   : > { %346 = vmatpush1.msra.mxu0 %v291_v8  ;;  %p927_p4 = pnand %p926_p1, %p1135_p0  ;;  %p933_p7 = scmp.lt.s32.totalorder %s931_s0, %s925_s26 }
  0x5d   : > { %749 = vmatmul.mubr.msk.f32.vlgmr.msra.gmra.mxu0 %vm311_vm0, %v290_v9 }
  0x5e   : > { %p928_p8 = pneg %p927_p4  ;;  %p934_p2 = por %p933_p7, %p932_p5 }
  0x60   : > { %p935_p6 = pnand %p934_p2, %p928_p8 }
 0x11d   : > { %v381_v21 = vpop.f32.mrf.mxu0 }
 0x11e   : > { %v382_v22 = vadd.f32 %v381_v21, %v304_v18 }
 0x11f   : > { %v383_v23 = vpop.f32.mrf.mxu0 }
 0x120   : > { %v391_v24 = vcombine.high %v382_v22, %v382_v22  ;;  %v398_v25 = vrot.slane %v382_v22, %v397_v19  ;;  %v384_v26 = vadd.f32 %v383_v23, %v308_v20 }
 0x122   : > { %v405_v27 = vrot.slane %v391_v24, %v397_v19  ;;  %v406_v28 = vcombine.high %v398_v25, %v398_v25  ;;  %v414_v29 = vrot.slane %v398_v25, %v397_v19  ;;  %v441_v30 = vcombine.high %v384_v26, %v384_v26 }
 0x123   : > { %v448_v31 = vrot.slane %v384_v26, %v397_v19 }
 0x124   : > { %v407_v32 = vcombine.high %v405_v27, %v405_v27  ;;  %v421_v33 = vrot.slane %v405_v27, %v397_v19  ;;  %v428_v34 = vrot.slane %v406_v28, %v397_v19  ;;  %v436_v35 = vcombine.high %v414_v29, %v414_v29 }
 0x125   : > { %v501_v36 = vrot.slane %v414_v29, %v1198_v14  ;;  %v455_v37 = vrot.slane %v441_v30, %v397_v19  ;;  %v456_v38 = vcombine.high %v448_v31, %v448_v31  ;;  %v464_v52 = vrot.slane %v448_v31, %v397_v19 }
 0x126   : > { %v435_v39 = vrot.slane %v407_v32, %v397_v19  ;;  %v437_v40 = vcombine.high %v421_v33, %v421_v33  ;;  %v438_v41 = vcombine.high %v428_v34, %v428_v34  ;;  %v505_v45 = vrot.slane %v428_v34, %v1198_v14 }
 0x127   : > { %v509_v49 = vrot.slane %v436_v35, %v1198_v14  ;;  %v517_v50 = vrot.slane %v421_v33, %v1198_v14  ;;  %v457_v51 = vcombine.high %v455_v37, %v455_v37  ;;  %v538_v59 = vmul.f32 %v501_v36, %v490_v42 }
 0x128   : > { %v439_v53 = vcombine.high %v435_v39, %v435_v39  ;;  %v513_v54 = vrot.slane %v438_v41, %v1198_v14  ;;  %v521_v55 = vrot.slane %v435_v39, %v1198_v14  ;;  %v525_v56 = vrot.slane %v437_v40, %v1198_v14 }
 0x129   : > { %v539_v60 = vmul.f32 %v505_v45, %v491_v43  ;;  %v540_v61 = vmul.f32 %v509_v49, %v492_v44  ;;  %v471_v62 = vrot.slane %v455_v37, %v397_v19  ;;  %v542_v1 = vmul.f32 %v517_v50, %v494_v47 }
 0x12a   : > { %v529_v63 = vrot.slane %v439_v53, %v1198_v14  ;;  %v541_v0 = vmul.f32 %v513_v54, %v493_v46  ;;  %v543_v2 = vmul.f32 %v521_v55, %v495_v48  ;;  %v478_v3 = vrot.slane %v456_v38, %v397_v19 }
 0x12b   : > { %v485_v4 = vrot.slane %v457_v51, %v397_v19  ;;  %v486_v5 = vcombine.high %v464_v52, %v464_v52  ;;  %v487_v6 = vcombine.high %v471_v62, %v471_v62  ;;  %v544_v7 = vmul.f32 %v525_v56, %v496_v57 }
 0x12c   : > { %v545_v8 = vmul.f32 %v529_v63, %v497_v58  ;;  %v549_v9 = vrot.slane %v464_v52, %v1198_v14  ;;  %v565_v10 = vrot.slane %v471_v62, %v1198_v14  ;;  %v488_v11 = vcombine.high %v478_v3, %v478_v3 }
 0x12d   : > { %v489_v12 = vcombine.high %v485_v4, %v485_v4  ;;  %v553_v13 = vrot.slane %v478_v3, %v1198_v14  ;;  %v557_v15 = vrot.slane %v486_v5, %v1198_v14  ;;  %v569_v16 = vrot.slane %v485_v4, %v1198_v14 }
 0x12e   : > { %v573_v17 = vrot.slane %v487_v6, %v1198_v14  ;;  %v586_v18 = vadd.f32 %v549_v9, %v538_v59  ;;  %v590_v19 = vadd.f32 %v565_v10, %v542_v1  ;;  %v561_v20 = vrot.slane %v488_v11, %v1198_v14 }
 0x12f   : > { %v577_v21 = vrot.slane %v489_v12, %v1198_v14  ;;  %v587_v22 = vadd.f32 %v553_v13, %v539_v60  ;;  %v588_v23 = vadd.f32 %v557_v15, %v540_v61  ;;  %v591_v24 = vadd.f32 %v569_v16, %v543_v2 }
 0x130   : > { %v592_v25 = vadd.f32 %v573_v17, %v544_v7  ;;  %594 = vst [vmem:[%s283_s27] sm:$0xff] %v586_v18  ;;  %598 = vst [vmem:[%s283_s27 + $0x20] sm:$0xff] %v590_v19  ;;  %v589_v26 = vadd.f32 %v561_v20, %v541_v0 }
 0x131   : > { %v593_v27 = vadd.f32 %v577_v21, %v545_v8  ;;  %595 = vst [vmem:[%s283_s27 + $0x8] sm:$0xff] %v587_v22  ;;  %596 = vst [vmem:[%s283_s27 + $0x10] sm:$0xff] %v588_v23 }
 0x132   : > { %599 = vst [vmem:[%s283_s27 + $0x28] sm:$0xff] %v591_v24  ;;  %600 = vst [vmem:[%s283_s27 + $0x30] sm:$0xff] %v592_v25 }
 0x133   : > { %597 = vst [vmem:[%s283_s27 + $0x18] sm:$0xff] %v589_v26  ;;  %601 = vst [vmem:[%s283_s27 + $0x38] sm:$0xff] %v593_v27 }
 0x134   : > { %938 = shalt.err (!%p935_p6)
}
 0x135   : > { %s939_s6 = scalar_lea.hbm %s1234_s14, 1024  ;;  %s943_s25 = scalar_lea.hbm %s1288_s4, 2048 }
 0x136   : > { %p940_p9 = scmp.ne.s32.totalorder %s1234_s14, %s939_s6  ;;  %p944_p11 = scmp.lt.s32.totalorder %s1234_s14, %s1288_s4 }
 0x137   : > { %p945_p3 = scmp.lt.s32.totalorder %s943_s25, %s939_s6 }
 0x138   : > { %p941_p12 = pnand %p940_p9, %p1135_p0 }
 0x139   : > { %p946_p1 = por %p945_p3, %p944_p11 }
 0x13a   : > { %p942_p13 = pneg %p941_p12 }
 0x13c   : > { %p947_p4 = pnand %p946_p1, %p942_p13 }
 0x13e   : > { %950 = shalt.err (!%p947_p4)
}
 0x13f   : > { %s1025_s12 = smov 128   ;;  %s1026_s21 = smov 8  }
 0x140   : > { %765 = dma.vmem_to_hbm [thread:$0]  (%p1135_p0), %s1236_s28, 1024, %s1234_s14, %s603_s9, %s1025_s12, %s1025_s12, %s1026_s21  }
 0x141 PF: > { %s632_s23 = sand.u32 1, %s993_s15   ;;  %p1305_p8 = scmp.ne.s32.totalorder %s1295_s24, 0 }
 0x142   : > { %s633_s13 = scalar_lea.sflag [#allocation5], %s632_s23 }
 0x143   : > { %p779_p5 = pnand %p738_p10, %p1305_p8 }
 0x145   : > { %p780_p7 = pneg %p779_p5 }
 0x147   : > { %988 = dma.done.wait (%p780_p7), %s633_s13, 1024  }
 0x148   : > { %990 = vsyncadd (%p780_p7), %s633_s13, 4294966272  ;;  %s23_s20 = sadd.s32 1, %s1013_s20   ;;  %s1306_s18 = sld [smem:[#allocation14_spill]] }
 0x149   : > { %p20_p2 = scmp.ge.s32.totalorder %s23_s20, 4   ;;  %s1307_s19 = sld [smem:[#allocation15_spill]] }
 0x14a   : > { %s1308_s15 = smov %s997_s16  ;;  %s1309_s16 = smov %s1001_s17 }
 0x14b   : > { %s1310_s17 = smov %s1144_s22  ;;  %22 = sbr.rel (!%p20_p2) target bundleno = 11 (0xb), region = 102 }
 0x150   :  { %638 = vsyncpa [#allocation4], 1 }
 0x151   :  { %640 = vsyncpa [#allocation4 + $0x1], 1 }
 0x152   :  { %641 = vsyncpa [#allocation7], 1 }
 0x153   :  { %643 = vsyncpa [#allocation7 + $0x1], 1 }
 0x154   :  { %644 = vsyncpa [#allocation5], 1 }
 0x155   :  { %646 = vsyncpa [#allocation5 + $0x1], 1 }

</bundles_post_ra>
